<compile_context>
chip_gen: v7x
topology: tpu7x:2x2x1
jax: 0.10.0
libtpu: 0.0.40
codegen_flags: <defaults>
</compile_context>

<pallas_src>
import jax
import jax.numpy as jnp
from jax import lax
from jax.experimental import pallas as pl
from jax.experimental.pallas import tpu as pltpu

EPS = 1e-5


def _round_up(n, m):
    return (n + m - 1) // m * m


# ---------------------------------------------------------------------------
# Parameter packing (one-time; NOT in the per-forward path)
# ---------------------------------------------------------------------------

def _w_offsets(H1, H2):
    o1 = 0
    o2 = o1 + _round_up(H1, 8)
    o3 = o2 + _round_up(H2, 8)
    rows = o3 + _round_up(1, 8)
    return o1, o2, o3, rows


def _gb_offsets(H1, H2):
    g1 = 0
    g2 = g1 + _round_up(H1, 8)
    g3 = g2 + _round_up(H2, 8)
    b1 = g3 + _round_up(1, 8)
    b2 = b1 + _round_up(H1, 8)
    b3 = b2 + _round_up(H2, 8)
    rows = b3 + _round_up(1, 8)
    return g1, g2, g3, b1, b2, b3, rows


def pack_params(params, input_size, hidden_sizes=(32, 32)):
    """Pack the model parameters into two small VMEM-friendly slabs.

    Call once per parameter update; conf_model_forward takes the packed dict,
    so the per-call path emits no scatter/pad ops.  Linear biases are dropped
    (cancelled by training-mode BN mean subtraction).
    """
    F = int(input_size)
    H1, H2 = (int(h) for h in hidden_sizes)
    Wmax = max(F, H1, H2)

    ow1, ow2, ow3, wrows = _w_offsets(H1, H2)
    w_all = jnp.zeros((wrows, Wmax), jnp.float32)
    w_all = w_all.at[ow1:ow1 + H1, :F].set(params["w1"])
    w_all = w_all.at[ow2:ow2 + H2, :H1].set(params["w2"])
    w_all = w_all.at[ow3:ow3 + 1, :H2].set(params["w3"])

    og1, og2, og3, ob1, ob2, ob3, grows = _gb_offsets(H1, H2)
    gb = jnp.zeros((grows, 1), jnp.float32)
    gb = gb.at[og1:og1 + H1, 0].set(params["g1"])
    gb = gb.at[og2:og2 + H2, 0].set(params["g2"])
    gb = gb.at[og3:og3 + 1, 0].set(params["g3"])
    gb = gb.at[ob1:ob1 + H1, 0].set(params["be1"])
    gb = gb.at[ob2:ob2 + H2, 0].set(params["be2"])
    gb = gb.at[ob3:ob3 + 1, 0].set(params["be3"])

    return {"w_all": w_all, "gb": gb, "input_size": F, "hidden_sizes": (H1, H2)}


# ---------------------------------------------------------------------------
# Kernel
# ---------------------------------------------------------------------------

def _make_kernel(F, H1, H2, B, transposed_input):
    ow1, ow2, ow3, _ = _w_offsets(H1, H2)
    og1, og2, og3, ob1, ob2, ob3, _ = _gb_offsets(H1, H2)
    inv_n = 1.0 / float(B)

    def kernel(x_ref, w_ref, gb_ref, o_ref):
        # Static slices of the packed parameter slabs (8-aligned rows, lane 0;
        # zero runtime cost, no lane rotates needed).
        w1 = w_ref[ow1:ow1 + H1, :F]                      # (H1, F)
        w2 = w_ref[ow2:ow2 + H2, :H1]                     # (H2, H1)
        w3 = w_ref[ow3:ow3 + 1, :H2]                      # (1,  H2)
        g1 = gb_ref[og1:og1 + H1, :]                      # (H1, 1)
        g2 = gb_ref[og2:og2 + H2, :]
        g3 = gb_ref[og3:og3 + 1, :]
        b1 = gb_ref[ob1:ob1 + H1, :]
        b2 = gb_ref[ob2:ob2 + H2, :]
        b3 = gb_ref[ob3:ob3 + 1, :]

        x = x_ref[...]

        # ---- layer 1: Linear -> BN -> ReLU --------------------------------
        if transposed_input:
            h = jnp.dot(w1, x, preferred_element_type=jnp.float32)        # (H1, B)
        else:
            # Contract the feature axes directly (MXU trans-B feed): no
            # host-side x.T; intermediates come out batch-on-lanes.
            h = lax.dot_general(w1, x, (((1,), (1,)), ((), ())),
                                preferred_element_type=jnp.float32)       # (H1, B)
        # Two-pass (h - mu) variance: raw inputs may have large means; the
        # single-pass E[h^2]-mu^2 form would risk cancellation here.
        mu = jnp.sum(h, axis=-1, keepdims=True) * inv_n                    # (H1, 1)
        d = h - mu
        var = jnp.sum(d * d, axis=-1, keepdims=True) * inv_n
        scale = lax.rsqrt(var + EPS) * g1                                  # (H1, 1) EUP
        h = jnp.maximum(d * scale + b1, 0.0)

        # ---- layer 2: Linear -> BN -> ReLU --------------------------------
        # Post-BN/ReLU inputs are O(1): single-pass stats are numerically safe
        # -> 4 wide VPU ops/elem (incl. ReLU) instead of 6, and one stats read
        # of the (H, B) buffer instead of two.
        h = jnp.dot(w2, h, preferred_element_type=jnp.float32)            # (H2, B)
        mu = jnp.sum(h, axis=-1, keepdims=True) * inv_n
        msq = jnp.sum(h * h, axis=-1, keepdims=True) * inv_n
        var = jnp.maximum(msq - mu * mu, 0.0)
        scale = lax.rsqrt(var + EPS) * g2
        offset = b2 - mu * scale
        h = jnp.maximum(h * scale + offset, 0.0)

        # ---- layer 3 (head): Linear -> BN, no ReLU -------------------------
        h = jnp.dot(w3, h, preferred_element_type=jnp.float32)            # (1, B)
        mu = jnp.sum(h, axis=-1, keepdims=True) * inv_n
        msq = jnp.sum(h * h, axis=-1, keepdims=True) * inv_n
        var = jnp.maximum(msq - mu * mu, 0.0)
        scale = lax.rsqrt(var + EPS) * g3
        offset = b3 - mu * scale
        o_ref[...] = (h * scale + offset).astype(o_ref.dtype)             # lane-dense (1, B)

    return kernel


# ---------------------------------------------------------------------------
# VMEM sizing (v7x-aware)
# ---------------------------------------------------------------------------

def _vmem_capacity_bytes():
    try:
        cap = getattr(pltpu.get_tpu_info(), "vmem_capacity_bytes", None)
        if cap:
            return int(cap)
    except Exception:
        pass
    return 64 * 1024 * 1024          # v7x per-TensorCore (smallest current gen)


def _tile_bytes_f32(rows, cols):
    # f32 VMEM tiling is (8 sublanes, 128 lanes); narrow dims pad up.
    return _round_up(max(rows, 1), 8) * _round_up(max(cols, 1), 128) * 4


def _vmem_limit_bytes(B, F, H1, H2, transposed_input):
    x_bytes = _tile_bytes_f32(F, B) if transposed_input else _tile_bytes_f32(B, F)
    # Live pre/post-BN hidden activations, head and output slabs.
    act_bytes = 3 * _tile_bytes_f32(max(H1, H2), B) + 2 * _tile_bytes_f32(1, B)
    need = x_bytes + act_bytes + (1 << 20)                 # params + slack
    cap = _vmem_capacity_bytes()
    limit = min(max(32 << 20, int(1.5 * need)), cap - (8 << 20))
    if need > limit:
        # TODO(synk): B-tiled multi-phase BN pipeline (+ v7x dual-core stat
        #             combine) for batches past the VMEM ceiling.
        raise ValueError(
            f"conf_model_forward: batch={B} needs ~{need >> 20} MiB of VMEM, "
            f"more than the ~{limit >> 20} MiB available on this device; pass "
            "x as (input_size, B) with transposed_input=True and/or split "
            "the batch.")
    return int(limit)


# ---------------------------------------------------------------------------
# Forward pass
# ---------------------------------------------------------------------------

def _forward_jax(x, packed, *, transposed_input=False):
    """Pure-JAX path (same math as the kernel) used for tiny batches."""
    F = packed["input_size"]
    H1, H2 = packed["hidden_sizes"]
    ow1, ow2, ow3, _ = _w_offsets(H1, H2)
    og1, og2, og3, ob1, ob2, ob3, _ = _gb_offsets(H1, H2)
    w_all, gb = packed["w_all"], packed["gb"]
    w1 = w_all[ow1:ow1 + H1, :F]
    w2 = w_all[ow2:ow2 + H2, :H1]
    w3 = w_all[ow3:ow3 + 1, :H2]

    def bn(h, g, b):
        mu = jnp.mean(h, axis=0, keepdims=True)
        var = jnp.mean((h - mu) ** 2, axis=0, keepdims=True)
        return (h - mu) * lax.rsqrt(var + EPS) * g + b

    xb = x.T if transposed_input else x                    # (B, F)
    h = jnp.maximum(bn(xb @ w1.T, gb[og1:og1 + H1, 0], gb[ob1:ob1 + H1, 0]), 0.0)
    h = jnp.maximum(bn(h @ w2.T, gb[og2:og2 + H2, 0], gb[ob2:ob2 + H2, 0]), 0.0)
    return bn(h @ w3.T, gb[og3:og3 + 1, 0], gb[ob3:ob3 + 1, 0])


def conf_model_forward(x, packed, *, transposed_input=False, min_pallas_batch=128):
    """conf_model forward pass (training-mode BatchNorm, batch statistics).

    x: (B, input_size) float32, or (input_size, B) if transposed_input=True
       (preferred for large B: feature-major x is lane-dense in VMEM and skips
       the in-kernel trans-B feed of a narrow, 128-lane-padded (B, F) block).
    packed: output of pack_params (pack once, reuse across calls).
    Returns (B, 1) float32.
    """
    F = packed["input_size"]
    H1, H2 = packed["hidden_sizes"]
    if transposed_input:
        Fx, B = x.shape
    else:
        B, Fx = x.shape
    if Fx != F:
        raise ValueError(f"feature dim {Fx} != packed input_size {F}")
    if B < 2:
        # PyTorch BatchNorm1d rejects B == 1 in training mode; so do we.
        raise ValueError("training-mode BatchNorm needs batch >= 2")

    if B < min_pallas_batch:
        # Tiny batch: the (*, B) lane tiles are mostly padding and the fixed
        # pallas_call/DMA overhead dominates -> pure JAX is faster.
        return _forward_jax(x, packed, transposed_input=transposed_input)

    out = pl.pallas_call(
        _make_kernel(F, H1, H2, B, transposed_input),
        out_shape=jax.ShapeDtypeStruct((1, B), jnp.float32),
        in_specs=[pl.BlockSpec(memory_space=pltpu.VMEM)] * 3,
        out_specs=pl.BlockSpec(memory_space=pltpu.VMEM),
        compiler_params=pltpu.CompilerParams(
            vmem_limit_bytes=_vmem_limit_bytes(B, F, H1, H2, transposed_input)),
    )(x, packed["w_all"], packed["gb"])
    return out.reshape(B, 1)


# ---------------------------------------------------------------------------
# Init + PyTorch-equivalent reference (keeps the Linear biases)
# ---------------------------------------------------------------------------

def init_params(key, input_size, hidden_sizes=(32, 32)):
    """PyTorch-style init: Linear weight/bias ~ U(-k, k), k = 1/sqrt(fan_in);
    BatchNorm gamma=1, beta=0.  Weights in PyTorch (out, in) layout."""
    sizes = [input_size] + list(hidden_sizes) + [1]
    params = {}
    for i in range(len(sizes) - 1):
        fan_in, fan_out = sizes[i], sizes[i + 1]
        key, kw, kb = jax.random.split(key, 3)
        bound = 1.0 / (float(fan_in) ** 0.5)
        params[f"w{i+1}"] = jax.random.uniform(
            kw, (fan_out, fan_in), jnp.float32, -bound, bound)
        params[f"b{i+1}"] = jax.random.uniform(
            kb, (fan_out,), jnp.float32, -bound, bound)
        params[f"g{i+1}"] = jnp.ones((fan_out,), jnp.float32)
        params[f"be{i+1}"] = jnp.zeros((fan_out,), jnp.float32)
    return params


def conf_model_ref(x, params):
    """Pure-JAX reference matching the PyTorch forward exactly (with biases)."""
    def bn(h, g, b):
        mu = jnp.mean(h, axis=0, keepdims=True)
        var = jnp.mean((h - mu) ** 2, axis=0, keepdims=True)
        return (h - mu) / jnp.sqrt(var + EPS) * g + b

    h = x @ params["w1"].T + params["b1"]
    h = jnp.maximum(bn(h, params["g1"], params["be1"]), 0.0)
    h = h @ params["w2"].T + params["b2"]
    h = jnp.maximum(bn(h, params["g2"], params["be2"]), 0.0)
    h = h @ params["w3"].T + params["b3"]
    return bn(h, params["g3"], params["be3"])


if __name__ == "__main__":
    key = jax.random.PRNGKey(0)
    k_params, k_x = jax.random.split(key)

    input_size = 16
    hidden_sizes = (32, 32)
    batch = 512          # multiple of 128 -> unmasked, lane-dense (1, B) output

    params = init_params(k_params, input_size, hidden_sizes)
    packed = pack_params(params, input_size, hidden_sizes)   # once, not per call
    x = jax.random.normal(k_x, (batch, input_size), jnp.float32)

    ref = conf_model_ref(x, params)        # PyTorch-equivalent (with biases)

    # 1) Primary Pallas path: (B, F) input, feature axes contracted in-kernel.
    out = jax.block_until_ready(conf_model_forward(x, packed))
    assert out.shape == (batch, 1), out.shape
    err = jnp.max(jnp.abs(out - ref))
    assert jnp.allclose(out, ref, atol=1e-4, rtol=1e-4), f"max abs err {err}"

    # 2) Expert path: caller supplies x already feature-major (F, B).
    out_t = jax.block_until_ready(
        conf_model_forward(x.T, packed, transposed_input=True))
    err_t = jnp.max(jnp.abs(out_t - ref))
    assert jnp.allclose(out_t, ref, atol=1e-4, rtol=1e-4), f"max abs err {err_t}"

    # 3) Tiny-batch fallback (pure JAX; also re-checks the bias-folding claim).
    x_small = x[:8]
    out_small = jax.block_until_ready(conf_model_forward(x_small, packed))
    ref_small = conf_model_ref(x_small, params)
    assert jnp.allclose(out_small, ref_small, atol=1e-4, rtol=1e-4)

    print("KERNEL_OK")
</pallas_src>

<mosaic_0001>
module attributes {stable_mosaic.version = 11 : i64} {
  func.func @kernel(%arg0: memref<512x16xf32, #tpu.memory_space<vmem>>, %arg1: memref<72x32xf32, #tpu.memory_space<vmem>>, %arg2: memref<144x1xf32, #tpu.memory_space<vmem>>, %arg3: memref<1x512xf32, #tpu.memory_space<vmem>>) attributes {dimension_semantics = [], scalar_prefetch = 0 : i64, scratch_operands = 0 : i64, tpu.core_type = #tpu.core_type<tc>} {
    %c0 = arith.constant 0 : index
    %c0_0 = arith.constant 0 : index
    %0 = vector.load %arg1[%c0, %c0_0] : memref<72x32xf32, #tpu.memory_space<vmem>>, vector<32x16xf32>
    %c32 = arith.constant 32 : index
    %c0_1 = arith.constant 0 : index
    %1 = vector.load %arg1[%c32, %c0_1] : memref<72x32xf32, #tpu.memory_space<vmem>>, vector<32x32xf32>
    %c64 = arith.constant 64 : index
    %c0_2 = arith.constant 0 : index
    %2 = vector.load %arg1[%c64, %c0_2] : memref<72x32xf32, #tpu.memory_space<vmem>>, vector<1x32xf32>
    %c0_3 = arith.constant 0 : index
    %c0_4 = arith.constant 0 : index
    %3 = vector.load %arg2[%c0_3, %c0_4] : memref<144x1xf32, #tpu.memory_space<vmem>>, vector<32x1xf32>
    %c32_5 = arith.constant 32 : index
    %c0_6 = arith.constant 0 : index
    %4 = vector.load %arg2[%c32_5, %c0_6] : memref<144x1xf32, #tpu.memory_space<vmem>>, vector<32x1xf32>
    %c64_7 = arith.constant 64 : index
    %c0_8 = arith.constant 0 : index
    %5 = vector.load %arg2[%c64_7, %c0_8] : memref<144x1xf32, #tpu.memory_space<vmem>>, vector<1x1xf32>
    %c72 = arith.constant 72 : index
    %c0_9 = arith.constant 0 : index
    %6 = vector.load %arg2[%c72, %c0_9] : memref<144x1xf32, #tpu.memory_space<vmem>>, vector<32x1xf32>
    %c104 = arith.constant 104 : index
    %c0_10 = arith.constant 0 : index
    %7 = vector.load %arg2[%c104, %c0_10] : memref<144x1xf32, #tpu.memory_space<vmem>>, vector<32x1xf32>
    %c136 = arith.constant 136 : index
    %c0_11 = arith.constant 0 : index
    %8 = vector.load %arg2[%c136, %c0_11] : memref<144x1xf32, #tpu.memory_space<vmem>>, vector<1x1xf32>
    %c0_12 = arith.constant 0 : index
    %c0_13 = arith.constant 0 : index
    %9 = vector.load %arg0[%c0_12, %c0_13] : memref<512x16xf32, #tpu.memory_space<vmem>>, vector<512x16xf32>
    %cst = arith.constant dense<0.000000e+00> : vector<32x512xf32>
    %10 = tpu.matmul %0, %9, %cst {dimension_numbers = #tpu.dot_dimension_numbers<[1], [1], [0], [0], [0, 0, 1, 0], [], []>} : vector<32x16xf32>, vector<512x16xf32>, vector<32x512xf32> -> vector<32x512xf32>
    %cst_14 = arith.constant dense<0.000000e+00> : vector<32xf32>
    %11 = vector.multi_reduction <add>, %10, %cst_14 [1] : vector<32x512xf32> to vector<32xf32>
    %12 = vector.shape_cast %11 : vector<32xf32> to vector<32x1xf32>
    %cst_15 = arith.constant 0.001953125 : f32
    %13 = vector.broadcast %cst_15 : f32 to vector<32x1xf32>
    %14 = arith.mulf %12, %13 : vector<32x1xf32>
    %15 = vector.broadcast %14 : vector<32x1xf32> to vector<32x512xf32>
    %16 = arith.subf %10, %15 : vector<32x512xf32>
    %17 = arith.mulf %16, %16 : vector<32x512xf32>
    %cst_16 = arith.constant dense<0.000000e+00> : vector<32xf32>
    %18 = vector.multi_reduction <add>, %17, %cst_16 [1] : vector<32x512xf32> to vector<32xf32>
    %19 = vector.shape_cast %18 : vector<32xf32> to vector<32x1xf32>
    %cst_17 = arith.constant 0.001953125 : f32
    %20 = vector.broadcast %cst_17 : f32 to vector<32x1xf32>
    %21 = arith.mulf %19, %20 : vector<32x1xf32>
    %cst_18 = arith.constant 9.99999974E-6 : f32
    %22 = vector.broadcast %cst_18 : f32 to vector<32x1xf32>
    %23 = arith.addf %21, %22 : vector<32x1xf32>
    %24 = math.rsqrt %23 : vector<32x1xf32>
    %25 = arith.mulf %24, %3 : vector<32x1xf32>
    %26 = vector.broadcast %25 : vector<32x1xf32> to vector<32x512xf32>
    %27 = arith.mulf %16, %26 : vector<32x512xf32>
    %28 = vector.broadcast %6 : vector<32x1xf32> to vector<32x512xf32>
    %29 = arith.addf %27, %28 : vector<32x512xf32>
    %cst_19 = arith.constant 0.000000e+00 : f32
    %30 = vector.broadcast %cst_19 : f32 to vector<32x512xf32>
    %31 = arith.maximumf %29, %30 : vector<32x512xf32>
    %cst_20 = arith.constant dense<0.000000e+00> : vector<32x512xf32>
    %32 = tpu.matmul %1, %31, %cst_20 {dimension_numbers = #tpu.dot_dimension_numbers<[1], [0], [0], [1], [0, 0, 1, 1], [], []>} : vector<32x32xf32>, vector<32x512xf32>, vector<32x512xf32> -> vector<32x512xf32>
    %cst_21 = arith.constant dense<0.000000e+00> : vector<32xf32>
    %33 = vector.multi_reduction <add>, %32, %cst_21 [1] : vector<32x512xf32> to vector<32xf32>
    %34 = vector.shape_cast %33 : vector<32xf32> to vector<32x1xf32>
    %cst_22 = arith.constant 0.001953125 : f32
    %35 = vector.broadcast %cst_22 : f32 to vector<32x1xf32>
    %36 = arith.mulf %34, %35 : vector<32x1xf32>
    %37 = arith.mulf %32, %32 : vector<32x512xf32>
    %cst_23 = arith.constant dense<0.000000e+00> : vector<32xf32>
    %38 = vector.multi_reduction <add>, %37, %cst_23 [1] : vector<32x512xf32> to vector<32xf32>
    %39 = vector.shape_cast %38 : vector<32xf32> to vector<32x1xf32>
    %cst_24 = arith.constant 0.001953125 : f32
    %40 = vector.broadcast %cst_24 : f32 to vector<32x1xf32>
    %41 = arith.mulf %39, %40 : vector<32x1xf32>
    %42 = arith.mulf %36, %36 : vector<32x1xf32>
    %43 = arith.subf %41, %42 : vector<32x1xf32>
    %cst_25 = arith.constant 0.000000e+00 : f32
    %44 = vector.broadcast %cst_25 : f32 to vector<32x1xf32>
    %45 = arith.maximumf %43, %44 : vector<32x1xf32>
    %cst_26 = arith.constant 9.99999974E-6 : f32
    %46 = vector.broadcast %cst_26 : f32 to vector<32x1xf32>
    %47 = arith.addf %45, %46 : vector<32x1xf32>
    %48 = math.rsqrt %47 : vector<32x1xf32>
    %49 = arith.mulf %48, %4 : vector<32x1xf32>
    %50 = arith.mulf %36, %49 : vector<32x1xf32>
    %51 = arith.subf %7, %50 : vector<32x1xf32>
    %52 = vector.broadcast %49 : vector<32x1xf32> to vector<32x512xf32>
    %53 = arith.mulf %32, %52 : vector<32x512xf32>
    %54 = vector.broadcast %51 : vector<32x1xf32> to vector<32x512xf32>
    %55 = arith.addf %53, %54 : vector<32x512xf32>
    %cst_27 = arith.constant 0.000000e+00 : f32
    %56 = vector.broadcast %cst_27 : f32 to vector<32x512xf32>
    %57 = arith.maximumf %55, %56 : vector<32x512xf32>
    %cst_28 = arith.constant dense<0.000000e+00> : vector<1x512xf32>
    %58 = tpu.matmul %2, %57, %cst_28 {dimension_numbers = #tpu.dot_dimension_numbers<[1], [0], [0], [1], [0, 0, 1, 1], [], []>} : vector<1x32xf32>, vector<32x512xf32>, vector<1x512xf32> -> vector<1x512xf32>
    %cst_29 = arith.constant dense<0.000000e+00> : vector<1xf32>
    %59 = vector.multi_reduction <add>, %58, %cst_29 [1] : vector<1x512xf32> to vector<1xf32>
    %60 = vector.shape_cast %59 : vector<1xf32> to vector<1x1xf32>
    %cst_30 = arith.constant 0.001953125 : f32
    %61 = vector.broadcast %cst_30 : f32 to vector<1x1xf32>
    %62 = arith.mulf %60, %61 : vector<1x1xf32>
    %63 = arith.mulf %58, %58 : vector<1x512xf32>
    %cst_31 = arith.constant dense<0.000000e+00> : vector<1xf32>
    %64 = vector.multi_reduction <add>, %63, %cst_31 [1] : vector<1x512xf32> to vector<1xf32>
    %65 = vector.shape_cast %64 : vector<1xf32> to vector<1x1xf32>
    %cst_32 = arith.constant 0.001953125 : f32
    %66 = vector.broadcast %cst_32 : f32 to vector<1x1xf32>
    %67 = arith.mulf %65, %66 : vector<1x1xf32>
    %68 = arith.mulf %62, %62 : vector<1x1xf32>
    %69 = arith.subf %67, %68 : vector<1x1xf32>
    %cst_33 = arith.constant 0.000000e+00 : f32
    %70 = vector.broadcast %cst_33 : f32 to vector<1x1xf32>
    %71 = arith.maximumf %69, %70 : vector<1x1xf32>
    %cst_34 = arith.constant 9.99999974E-6 : f32
    %72 = vector.broadcast %cst_34 : f32 to vector<1x1xf32>
    %73 = arith.addf %71, %72 : vector<1x1xf32>
    %74 = math.rsqrt %73 : vector<1x1xf32>
    %75 = arith.mulf %74, %5 : vector<1x1xf32>
    %76 = arith.mulf %62, %75 : vector<1x1xf32>
    %77 = arith.subf %8, %76 : vector<1x1xf32>
    %78 = vector.broadcast %75 : vector<1x1xf32> to vector<1x512xf32>
    %79 = arith.mulf %58, %78 : vector<1x512xf32>
    %80 = vector.broadcast %77 : vector<1x1xf32> to vector<1x512xf32>
    %81 = arith.addf %79, %80 : vector<1x512xf32>
    %c0_35 = arith.constant 0 : index
    %c0_36 = arith.constant 0 : index
    %82 = vector.load %arg3[%c0_35, %c0_36] : memref<1x512xf32, #tpu.memory_space<vmem>>, vector<1x512xf32>
    tpu.vector_store %arg3[%c0_35, %c0_36], %81 {strides = array<i32>} : memref<1x512xf32, #tpu.memory_space<vmem>>, vector<1x512xf32>,
    return
  }
}

</mosaic_0001>

<bundles_post_ra>
// kernel: tpu_custom_call.1
= control target key start
LH: loop header
LB: loop body
LE: loop exit
PB: predicated region body
PF: predicated region fallthrough
CT: control target
= control target key end

     0   :  { %vm106_vm0 = vcmask 130048   ;;  %s2231_s0 = inlined_call_operand.vmem [shape: f32[512,16], index: 0, kind: input, shape index: {}]   ;;  %s2232_s1 = inlined_call_operand.vmem [shape: f32[72,32], index: 1, kind: input, shape index: {}]   ;;  %s2233_s2 = inlined_call_operand.vmem [shape: f32[144,1], index: 2, kind: input, shape index: {}]   ;;  %s2234_s3 = inlined_call_operand.hbm [shape: f32[1,512], index: 3, kind: output, shape index: {}]  }
   0x1   :  { %v58_v0 = vld [vmem:[%s2231_s0 + $0x80] sm:$0xff]  ;;  %v59_v1 = vld [vmem:[%s2231_s0 + $0x88] sm:$0xff]  ;;  %vm1661_vm1 = vmpackc.low %vm106_vm0, %vm106_vm0 }
   0x2   :  { %v42_v2 = vld [vmem:[%s2231_s0] sm:$0xff]  ;;  %v1450_v3 = vpack.c.bf16 %v59_v1, %v58_v0  ;;  %v43_v5 = vld [vmem:[%s2231_s0 + $0x8] sm:$0xff]  ;;  %v60_v13 = vld [vmem:[%s2231_s0 + $0x90] sm:$0xff] }
   0x3   :  { %v90_v6 = vld [vmem:[%s2231_s0 + $0x180] sm:$0xff]  ;;  %v1453_v7 = vpack.c.bf16 %v43_v5, %v42_v2  ;;  %v91_v8 = vld [vmem:[%s2231_s0 + $0x188] sm:$0xff]  ;;  %v61_v14 = vld [vmem:[%s2231_s0 + $0x98] sm:$0xff] }
   0x4   :  { %v74_v9 = vld [vmem:[%s2231_s0 + $0x100] sm:$0xff]  ;;  %v75_v10 = vld [vmem:[%s2231_s0 + $0x108] sm:$0xff]  ;;  %1452 = vmatprep.subr.msk.bf16.mxu0 %vm1661_vm1, %v1450_v3  ;;  %v1498_v11 = vpack.c.bf16 %v91_v8, %v90_v6  ;;  %v1456_v15 = vpack.c.bf16 %v61_v14, %v60_v13  ;;  %v92_v16 = vld [vmem:[%s2231_s0 + $0x190] sm:$0xff] }
   0x5   :  { %v1501_v12 = vpack.c.bf16 %v75_v10, %v74_v9  ;;  %1455 = vmatpush3.bf16.xpose.msk.msra.mxu0 %vm1661_vm1, %v1453_v7  ;;  %v93_v17 = vld [vmem:[%s2231_s0 + $0x198] sm:$0xff]  ;;  %v44_v18 = vld [vmem:[%s2231_s0 + $0x10] sm:$0xff]  ;;  %v62_v21 = vld [vmem:[%s2231_s0 + $0xa0] sm:$0xff] }
   0x6   :  { %1500 = vmatprep.subr.msk.bf16.mxu1 %vm1661_vm1, %v1498_v11  ;;  %v45_v19 = vld [vmem:[%s2231_s0 + $0x18] sm:$0xff]  ;;  %v1504_v20 = vpack.c.bf16 %v93_v17, %v92_v16  ;;  %1458 = vmatprep.subr.msk.bf16.mxu0 %vm1661_vm1, %v1456_v15  ;;  %v63_v22 = vld [vmem:[%s2231_s0 + $0xa8] sm:$0xff]  ;;  %v76_v23 = vld [vmem:[%s2231_s0 + $0x110] sm:$0xff] }
   0x7   :  { %1503 = vmatpush3.bf16.xpose.msk.msra.mxu1 %vm1661_vm1, %v1501_v12  ;;  %v77_v24 = vld [vmem:[%s2231_s0 + $0x118] sm:$0xff]  ;;  %v1459_v25 = vpack.c.bf16 %v45_v19, %v44_v18  ;;  %v94_v26 = vld [vmem:[%s2231_s0 + $0x1a0] sm:$0xff]  ;;  %v95_v27 = vld [vmem:[%s2231_s0 + $0x1a8] sm:$0xff]  ;;  %v1462_v28 = vpack.c.bf16 %v63_v22, %v62_v21 }
   0x8   :  { %1506 = vmatprep.subr.msk.bf16.mxu1 %vm1661_vm1, %v1504_v20  ;;  %v1507_v29 = vpack.c.bf16 %v77_v24, %v76_v23  ;;  %v1510_v30 = vpack.c.bf16 %v95_v27, %v94_v26  ;;  %v46_v31 = vld [vmem:[%s2231_s0 + $0x20] sm:$0xff]  ;;  %v47_v32 = vld [vmem:[%s2231_s0 + $0x28] sm:$0xff]  ;;  %v64_v33 = vld [vmem:[%s2231_s0 + $0xb0] sm:$0xff] }
   0x9   :  { %v65_v34 = vld [vmem:[%s2231_s0 + $0xb8] sm:$0xff]  ;;  %v78_v35 = vld [vmem:[%s2231_s0 + $0x120] sm:$0xff]  ;;  %v79_v36 = vld [vmem:[%s2231_s0 + $0x128] sm:$0xff]  ;;  %v1465_v37 = vpack.c.bf16 %v47_v32, %v46_v31 }
   0xa   :  { %v96_v38 = vld [vmem:[%s2231_s0 + $0x1b0] sm:$0xff]  ;;  %v97_v39 = vld [vmem:[%s2231_s0 + $0x1b8] sm:$0xff]  ;;  %v1468_v40 = vpack.c.bf16 %v65_v34, %v64_v33  ;;  %v1513_v41 = vpack.c.bf16 %v79_v36, %v78_v35  ;;  %v1773_v45 = vld [vmem:[%s2232_s1] sm:$0xff] }
   0xb   :  { %v1516_v42 = vpack.c.bf16 %v97_v39, %v96_v38  ;;  %v48_v43 = vld [vmem:[%s2231_s0 + $0x30] sm:$0xff]  ;;  %v49_v44 = vld [vmem:[%s2231_s0 + $0x38] sm:$0xff]  ;;  %v66_v46 = vld [vmem:[%s2231_s0 + $0xc0] sm:$0xff]  ;;  %1402 = vmatprep.mubr.msk.f32.mxu0 %vm106_vm0, %v1773_v45  ;;  %1442 = vmatprep.mubr.msk.f32.mxu1 %vm106_vm0, %v1773_v45 }
   0xc   :  { %v67_v47 = vld [vmem:[%s2231_s0 + $0xc8] sm:$0xff]  ;;  %v80_v48 = vld [vmem:[%s2231_s0 + $0x130] sm:$0xff]  ;;  %v81_v49 = vld [vmem:[%s2231_s0 + $0x138] sm:$0xff] }
   0xd   :  { %1461 = vmatpush3.bf16.xpose.msk.msra.mxu0 %vm1661_vm1, %v1459_v25 }
   0xe   :  { %1464 = vmatprep.subr.msk.bf16.mxu0 %vm1661_vm1, %v1462_v28 }
   0xf   :  { %1509 = vmatpush3.bf16.xpose.msk.msra.mxu1 %vm1661_vm1, %v1507_v29 }
  0x10   :  { %1512 = vmatprep.subr.msk.bf16.mxu1 %vm1661_vm1, %v1510_v30 }
  0x15   :  { %1467 = vmatpush3.bf16.xpose.msk.msra.mxu0 %vm1661_vm1, %v1465_v37 }
  0x16   :  { %1470 = vmatprep.subr.msk.bf16.mxu0 %vm1661_vm1, %v1468_v40 }
  0x17   :  { %1515 = vmatpush3.bf16.xpose.msk.msra.mxu1 %vm1661_vm1, %v1513_v41 }
  0x18   :  { %1518 = vmatprep.subr.msk.bf16.mxu1 %vm1661_vm1, %v1516_v42 }
  0x19   :  { %8 = vsyncpa [#allocation3], 0  ;;  %v1471_v50 = vpack.c.bf16 %v49_v44, %v48_v43  ;;  %v98_v51 = vld [vmem:[%s2231_s0 + $0x1c0] sm:$0xff]  ;;  %v99_v52 = vld [vmem:[%s2231_s0 + $0x1c8] sm:$0xff]  ;;  %v1474_v53 = vpack.c.bf16 %v67_v47, %v66_v46  ;;  %v1519_v54 = vpack.c.bf16 %v81_v49, %v80_v48  ;;  %vm669_vm2 = vcmask 261120  }
  0x1a   :  { %v1522_v55 = vpack.c.bf16 %v99_v52, %v98_v51  ;;  %v50_v56 = vld [vmem:[%s2231_s0 + $0x40] sm:$0xff]  ;;  %v51_v57 = vld [vmem:[%s2231_s0 + $0x48] sm:$0xff]  ;;  %v68_v58 = vld [vmem:[%s2231_s0 + $0xd0] sm:$0xff]  ;;  %vm1189_vm3 = vcmask 1040384  }
  0x1b   :  { %v69_v59 = vld [vmem:[%s2231_s0 + $0xd8] sm:$0xff]  ;;  %v82_v60 = vld [vmem:[%s2231_s0 + $0x140] sm:$0xff]  ;;  %v83_v61 = vld [vmem:[%s2231_s0 + $0x148] sm:$0xff]  ;;  %v1477_v62 = vpack.c.bf16 %v51_v57, %v50_v56 }
  0x1c   :  { %v100_v63 = vld [vmem:[%s2231_s0 + $0x1d0] sm:$0xff]  ;;  %v101_v0 = vld [vmem:[%s2231_s0 + $0x1d8] sm:$0xff]  ;;  %v1480_v1 = vpack.c.bf16 %v69_v59, %v68_v58  ;;  %v1525_v2 = vpack.c.bf16 %v83_v61, %v82_v60  ;;  %v70_v7 = vld [vmem:[%s2231_s0 + $0xe0] sm:$0xff] }
  0x1d   :  { %1473 = vmatpush3.bf16.xpose.msk.msra.mxu0 %vm1661_vm1, %v1471_v50  ;;  %v1528_v3 = vpack.c.bf16 %v101_v0, %v100_v63  ;;  %v52_v5 = vld [vmem:[%s2231_s0 + $0x50] sm:$0xff]  ;;  %v53_v6 = vld [vmem:[%s2231_s0 + $0x58] sm:$0xff]  ;;  %v71_v8 = vld [vmem:[%s2231_s0 + $0xe8] sm:$0xff] }
  0x1e   :  { %1476 = vmatprep.subr.msk.bf16.mxu0 %vm1661_vm1, %v1474_v53  ;;  %v84_v9 = vld [vmem:[%s2231_s0 + $0x150] sm:$0xff]  ;;  %v85_v10 = vld [vmem:[%s2231_s0 + $0x158] sm:$0xff]  ;;  %v1483_v11 = vpack.c.bf16 %v53_v6, %v52_v5  ;;  %v102_v12 = vld [vmem:[%s2231_s0 + $0x1e0] sm:$0xff]  ;;  %v1486_v14 = vpack.c.bf16 %v71_v8, %v70_v7 }
  0x1f   :  { %1521 = vmatpush3.bf16.xpose.msk.msra.mxu1 %vm1661_vm1, %v1519_v54  ;;  %v103_v13 = vld [vmem:[%s2231_s0 + $0x1e8] sm:$0xff]  ;;  %v1531_v15 = vpack.c.bf16 %v85_v10, %v84_v9  ;;  %v54_v17 = vld [vmem:[%s2231_s0 + $0x60] sm:$0xff]  ;;  %v72_v19 = vld [vmem:[%s2231_s0 + $0xf0] sm:$0xff] }
  0x20   :  { %1524 = vmatprep.subr.msk.bf16.mxu1 %vm1661_vm1, %v1522_v55  ;;  %v1534_v16 = vpack.c.bf16 %v103_v13, %v102_v12  ;;  %v55_v18 = vld [vmem:[%s2231_s0 + $0x68] sm:$0xff]  ;;  %v73_v20 = vld [vmem:[%s2231_s0 + $0xf8] sm:$0xff]  ;;  %v86_v21 = vld [vmem:[%s2231_s0 + $0x160] sm:$0xff] }
  0x21   :  { %v87_v22 = vld [vmem:[%s2231_s0 + $0x168] sm:$0xff]  ;;  %v1489_v23 = vpack.c.bf16 %v55_v18, %v54_v17  ;;  %v104_v24 = vld [vmem:[%s2231_s0 + $0x1f0] sm:$0xff]  ;;  %v105_v25 = vld [vmem:[%s2231_s0 + $0x1f8] sm:$0xff]  ;;  %v1492_v26 = vpack.c.bf16 %v73_v20, %v72_v19 }
  0x22   :  { %v1537_v27 = vpack.c.bf16 %v87_v22, %v86_v21  ;;  %v1540_v28 = vpack.c.bf16 %v105_v25, %v104_v24  ;;  %v56_v29 = vld [vmem:[%s2231_s0 + $0x70] sm:$0xff]  ;;  %v57_v30 = vld [vmem:[%s2231_s0 + $0x78] sm:$0xff]  ;;  %v16_v35 = vld [vmem:[%s2232_s1 + $0x8] sm:$0xff] }
  0x23   :  { %v88_v31 = vld [vmem:[%s2231_s0 + $0x170] sm:$0xff]  ;;  %v89_v32 = vld [vmem:[%s2231_s0 + $0x178] sm:$0xff]  ;;  %v1495_v33 = vpack.c.bf16 %v57_v30, %v56_v29 }
  0x24   :  { %v1543_v34 = vpack.c.bf16 %v89_v32, %v88_v31  ;;  %v17_v36 = vld [vmem:[%s2232_s1 + $0x10] sm:$0xff]  ;;  %v18_v4 = vld [vmem:[%s2232_s1 + $0x18] sm:$0xff] }
  0x25   :  { %1479 = vmatpush3.bf16.xpose.msk.msra.mxu0 %vm1661_vm1, %v1477_v62 }
  0x26   :  { %1482 = vmatprep.subr.msk.bf16.mxu0 %vm1661_vm1, %v1480_v1 }
  0x27   :  { %1527 = vmatpush3.bf16.xpose.msk.msra.mxu1 %vm1661_vm1, %v1525_v2 }
  0x28   :  { %1530 = vmatprep.subr.msk.bf16.mxu1 %vm1661_vm1, %v1528_v3 }
  0x2d   :  { %1485 = vmatpush3.bf16.xpose.msk.msra.mxu0 %vm1661_vm1, %v1483_v11 }
  0x2e   :  { %1488 = vmatprep.subr.msk.bf16.mxu0 %vm1661_vm1, %v1486_v14 }
  0x2f   :  { %1533 = vmatpush3.bf16.xpose.msk.msra.mxu1 %vm1661_vm1, %v1531_v15 }
  0x30   :  { %1536 = vmatprep.subr.msk.bf16.mxu1 %vm1661_vm1, %v1534_v16 }
  0x35   :  { %1491 = vmatpush3.bf16.xpose.msk.msra.mxu0 %vm1661_vm1, %v1489_v23 }
  0x36   :  { %1494 = vmatprep.subr.msk.bf16.mxu0 %vm1661_vm1, %v1492_v26 }
  0x37   :  { %1539 = vmatpush3.bf16.xpose.msk.msra.mxu1 %vm1661_vm1, %v1537_v27 }
  0x38   :  { %1542 = vmatprep.subr.msk.bf16.mxu1 %vm1661_vm1, %v1540_v28 }
  0x3d   :  { %1497 = vmatpush3.bf16.xpose.msk.msra.mxu0 %vm1661_vm1, %v1495_v33 }
  0x3f   :  { %1545 = vmatpush3.bf16.xpose.msk.msra.mxu1 %vm1661_vm1, %v1543_v34 }
  0x44   :  { %1403 = vmatmul.mubr.msk.f32.vlgmr.msra.gmra.mrb[0].mxu0 %vm106_vm0, %v1773_v45 }
  0x45   :  { %1404 = vmatprep.mubr.msk.f32.mxu0 %vm106_vm0, %v16_v35 }
  0x46   :  { %1443 = vmatmul.mubr.msk.f32.vlgmr.msra.gmra.mrb[0].mxu1 %vm106_vm0, %v1773_v45 }
  0x47   :  { %1444 = vmatprep.mubr.msk.f32.mxu1 %vm106_vm0, %v16_v35 }
  0x48   :  { %1405 = vmatmul.mubr.msk.f32.gmra.mrb[2].mxu0 %vm106_vm0, %v16_v35 }
  0x49   :  { %1406 = vmatprep.mubr.msk.f32.mxu0 %vm106_vm0, %v17_v36 }
  0x4a   :  { %1445 = vmatmul.mubr.msk.f32.gmra.mrb[2].mxu1 %vm106_vm0, %v16_v35 }
  0x4b   :  { %1446 = vmatprep.mubr.msk.f32.mxu1 %vm106_vm0, %v17_v36 }
  0x4c   :  { %1407 = vmatmul.mubr.msk.f32.gmra.mrb[4].mxu0 %vm106_vm0, %v17_v36 }
  0x4d   :  { %1408 = vmatprep.mubr.msk.f32.mxu0 %vm106_vm0, %v18_v4 }
  0x4e   :  { %1447 = vmatmul.mubr.msk.f32.gmra.mrb[4].mxu1 %vm106_vm0, %v17_v36 }
  0x4f   :  { %1448 = vmatprep.mubr.msk.f32.mxu1 %vm106_vm0, %v18_v4 }
  0x50   :  { %1409 = vmatmul.mubr.msk.f32.gmra.mrb[6].mxu0 %vm106_vm0, %v18_v4 }
  0x52   :  { %1449 = vmatmul.mubr.msk.f32.gmra.mrb[6].mxu1 %vm106_vm0, %v18_v4 }
 0x117   :  { %v377_v37 = vpop.f32.mrb[0].mxu0 }
 0x118   :  { %v379_v38 = vpop.f32.mrb[1].mxu0 }
 0x119   :  { %v489_v39 = vadd.f32 %v379_v38, %v377_v37  ;;  %v466_v40 = vpop.f32.mrb[0].mxu1 }
 0x11a   :  { %v468_v41 = vpop.f32.mrb[1].mxu1 }
 0x11b   :  { %v490_v42 = vadd.f32 %v489_v39, %v466_v40  ;;  %v383_v43 = vpop.f32.mrb[2].mxu0 }
 0x11c   :  { %v385_v44 = vpop.f32.mrb[3].mxu0 }
 0x11d   :  { %v494_v45 = vadd.f32 %v385_v44, %v383_v43  ;;  %v472_v46 = vpop.f32.mrb[2].mxu1  ;;  %v491_v47 = vadd.f32 %v490_v42, %v468_v41 }
 0x11e   :  { %v474_v48 = vpop.f32.mrb[3].mxu1 }
 0x11f   :  { %v495_v49 = vadd.f32 %v494_v45, %v472_v46  ;;  %492 = vadd.xlane.f32.xlu0 %v491_v47  ;;  %v389_v50 = vpop.f32.mrb[4].mxu0 }
 0x120   :  { %v391_v51 = vpop.f32.mrb[5].mxu0 }
 0x121   :  { %v499_v52 = vadd.f32 %v391_v51, %v389_v50  ;;  %v478_v53 = vpop.f32.mrb[4].mxu1  ;;  %v496_v54 = vadd.f32 %v495_v49, %v474_v48 }
 0x122   :  { %v480_v55 = vpop.f32.mrb[5].mxu1 }
 0x123   :  { %v500_v56 = vadd.f32 %v499_v52, %v478_v53  ;;  %497 = vadd.xlane.f32.xlu0 %v496_v54  ;;  %v395_v57 = vpop.f32.mrb[6].mxu0  ;;  %v33_v54 = vld [vmem:[%s2233_s2 + $0x48] sm:$0xff] }
 0x124   :  { %v397_v58 = vpop.f32.mrb[7].mxu0 }
 0x125   :  { %v504_v59 = vadd.f32 %v397_v58, %v395_v57  ;;  %v484_v60 = vpop.f32.mrb[6].mxu1  ;;  %v501_v61 = vadd.f32 %v500_v56, %v480_v55  ;;  %v35_v56 = vld [vmem:[%s2233_s2 + $0x58] sm:$0xff] }
 0x126   :  { %v486_v62 = vpop.f32.mrb[7].mxu1 }
 0x127   :  { %v505_v63 = vadd.f32 %v504_v59, %v484_v60  ;;  %502 = vadd.xlane.f32.xlu1 %v501_v61 }
 0x129   :  { %v506_v0 = vadd.f32 %v505_v63, %v486_v62 }
 0x12b   :  { %507 = vadd.xlane.f32.xlu1 %v506_v0 }
 0x1ac   :  { %v493_v1 = vpop.xlane.xlu0 %492 }
 0x1ad   :  { %v509_v2 = vmul.f32 0.001953125, %v493_v1 }
 0x1af   :  { %v1946_v3 = vsub.f32 %v377_v37, %v509_v2  ;;  %v1948_v5 = vsub.f32 %v379_v38, %v509_v2  ;;  %v1950_v6 = vsub.f32 %v466_v40, %v509_v2  ;;  %v1952_v8 = vsub.f32 %v468_v41, %v509_v2 }
 0x1b0   :  { %v498_v7 = vpop.xlane.xlu0 %497 }
 0x1b1   :  { %v510_v9 = vmul.f32 0.001953125, %v498_v7  ;;  %v529_v10 = vmul.f32 %v1946_v3, %v1946_v3  ;;  %v530_v11 = vmul.f32 %v1948_v5, %v1948_v5  ;;  %v531_v12 = vmul.f32 %v1950_v6, %v1950_v6 }
 0x1b2   :  { %v532_v18 = vmul.f32 %v1952_v8, %v1952_v8 }
 0x1b3   :  { %v1960_v13 = vsub.f32 %v383_v43, %v510_v9  ;;  %v1962_v14 = vsub.f32 %v385_v44, %v510_v9  ;;  %v545_v15 = vadd.f32 %v530_v11, %v529_v10  ;;  %v1964_v16 = vsub.f32 %v472_v46, %v510_v9 }
 0x1b4   :  { %v503_v17 = vpop.xlane.xlu1 %502  ;;  %v1968_v19 = vsub.f32 %v474_v48, %v510_v9  ;;  %v24_v9 = vld [vmem:[%s2233_s2] sm:$0xff] }
 0x1b5   :  { %v511_v20 = vmul.f32 0.001953125, %v503_v17  ;;  %v546_v21 = vadd.f32 %v545_v15, %v531_v12  ;;  %v533_v22 = vmul.f32 %v1960_v13, %v1960_v13  ;;  %v534_v23 = vmul.f32 %v1962_v14, %v1962_v14  ;;  %v25_v15 = vld [vmem:[%s2233_s2 + $0x8] sm:$0xff] }
 0x1b6   :  { %v535_v24 = vmul.f32 %v1964_v16, %v1964_v16  ;;  %v536_v30 = vmul.f32 %v1968_v19, %v1968_v19 }
 0x1b7   :  { %v1976_v25 = vsub.f32 %v389_v50, %v511_v20  ;;  %v1978_v26 = vsub.f32 %v391_v51, %v511_v20  ;;  %v547_v27 = vadd.f32 %v546_v21, %v532_v18  ;;  %v550_v28 = vadd.f32 %v534_v23, %v533_v22  ;;  %v27_v23 = vld [vmem:[%s2233_s2 + $0x18] sm:$0xff] }
 0x1b8   :  { %v508_v29 = vpop.xlane.xlu1 %507  ;;  %v1982_v31 = vsub.f32 %v478_v53, %v511_v20  ;;  %v1984_v32 = vsub.f32 %v480_v55, %v511_v20  ;;  %v1626_v53 = vmov 0   ;;  %v34_v55 = vld [vmem:[%s2233_s2 + $0x50] sm:$0xff] }
 0x1b9   :  { %v512_v33 = vmul.f32 0.001953125, %v508_v29  ;;  %548 = vadd.xlane.f32.xlu0 %v547_v27  ;;  %v551_v34 = vadd.f32 %v550_v28, %v535_v24  ;;  %v537_v35 = vmul.f32 %v1976_v25, %v1976_v25  ;;  %v538_v36 = vmul.f32 %v1978_v26, %v1978_v26  ;;  %1583 = vset.pattern.permute.xlu1 %v1626_v53  ;;  %v26_v20 = vld [vmem:[%s2233_s2 + $0x10] sm:$0xff]  ;;  %v36_v28 = vld [vmem:[%s2233_s2 + $0x60] sm:$0xff] }
 0x1ba   :  { %v539_v4 = vmul.f32 %v1982_v31, %v1982_v31  ;;  %v540_v41 = vmul.f32 %v1984_v32, %v1984_v32  ;;  %1582 = vset.pattern.permute.xlu0 %v1626_v53  ;;  %v1627_v29 = vmov 0.0  }
 0x1bb   :  { %v1992_v37 = vsub.f32 %v395_v57, %v512_v33  ;;  %v1994_v38 = vsub.f32 %v397_v58, %v512_v33  ;;  %v552_v39 = vadd.f32 %v551_v34, %v536_v30  ;;  %v555_v40 = vadd.f32 %v538_v36, %v537_v35  ;;  %746 = vmatprep.mubr.f32.mxu0 %v1627_v29 }
 0x1bc   :  { %v1998_v42 = vsub.f32 %v484_v60, %v512_v33  ;;  %v2000_v44 = vsub.f32 %v486_v62, %v512_v33  ;;  %835 = vmatprep.mubr.f32.mxu1 %v1627_v29 }
 0x1bd   :  { %553 = vadd.xlane.f32.xlu1 %v552_v39  ;;  %v556_v43 = vadd.f32 %v555_v40, %v539_v4  ;;  %v541_v45 = vmul.f32 %v1992_v37, %v1992_v37  ;;  %v542_v46 = vmul.f32 %v1994_v38, %v1994_v38 }
 0x1be   :  { %v543_v48 = vmul.f32 %v1998_v42, %v1998_v42  ;;  %v544_v50 = vmul.f32 %v2000_v44, %v2000_v44 }
 0x1bf   :  { %v557_v47 = vadd.f32 %v556_v43, %v540_v41  ;;  %v560_v49 = vadd.f32 %v542_v46, %v541_v45 }
 0x1c1   :  { %558 = vadd.xlane.f32.xlu0 %v557_v47  ;;  %v561_v51 = vadd.f32 %v560_v49, %v543_v48 }
 0x1c3   :  { %v562_v52 = vadd.f32 %v561_v51, %v544_v50 }
 0x1c5   :  { %563 = vadd.xlane.f32.xlu1 %v562_v52 }
 0x1d6   :  { %619 = vperm.xlu1 %1583, %v33_v54  }
 0x1da   :  { %624 = vperm.xlu1 %1583, %v34_v55  }
 0x1de   :  { %629 = vperm.xlu1 %1583, %v35_v56  }
 0x246   :  { %v549_v57 = vpop.xlane.xlu0 %548 }
 0x247   :  { %v565_v58 = vmul.f32 0.001953125, %v549_v57 }
 0x249   :  { %v569_v59 = vadd.f32 1e-05, %v565_v58 }
 0x24a   :  { %v554_v60 = vpop.xlane.xlu1 %553 }
 0x24b   :  { %1584 = vrsqrt.f32 %v569_v59  ;;  %v566_v61 = vmul.f32 0.001953125, %v554_v60 }
 0x24d   :  { %v570_v62 = vadd.f32 1e-05, %v566_v61 }
 0x24e   :  { %v559_v63 = vpop.xlane.xlu0 %558 }
 0x24f   :  { %1586 = vrsqrt.f32 %v570_v62  ;;  %v567_v0 = vmul.f32 0.001953125, %v559_v63 }
 0x251   :  { %v571_v1 = vadd.f32 1e-05, %v567_v0 }
 0x252   :  { %v564_v2 = vpop.xlane.xlu1 %563 }
 0x253   :  { %1588 = vrsqrt.f32 %v571_v1  ;;  %v568_v7 = vmul.f32 0.001953125, %v564_v2 }
 0x255   :  { %v1585_v10 = vpop.eup %1584  ;;  %v572_v11 = vadd.f32 1e-05, %v568_v7 }
 0x256   :  { %v577_v12 = vmul.f32 %v1585_v10, %v24_v9  ;;  %v620_v30 = vpop.permute.xlu1 %619 }
 0x257   :  { %1590 = vrsqrt.f32 %v572_v11 }
 0x258   :  { %583 = vperm.xlu0 %1582, %v577_v12  }
 0x259   :  { %v1587_v17 = vpop.eup %1586 }
 0x25a   :  { %v578_v18 = vmul.f32 %v1587_v17, %v25_v15  ;;  %v625_v33 = vpop.permute.xlu1 %624 }
 0x25c   :  { %588 = vperm.xlu1 %1583, %v578_v18  }
 0x25d   :  { %v1589_v21 = vpop.eup %1588 }
 0x25e   :  { %v579_v22 = vmul.f32 %v1589_v21, %v26_v20  ;;  %v630_v34 = vpop.permute.xlu1 %629 }
 0x260   :  { %593 = vperm.xlu1 %1583, %v579_v22  }
 0x261   :  { %v1591_v24 = vpop.eup %1590 }
 0x262   :  { %v580_v27 = vmul.f32 %v1591_v24, %v27_v23 }
 0x264   :  { %598 = vperm.xlu1 %1583, %v580_v27  }
 0x268   :  { %634 = vperm.xlu1 %1583, %v36_v28  }
 0x2d7   :  { %v584_v35 = vpop.permute.xlu0 %583 }
 0x2d8   :  { %v601_v36 = vmul.f32 %v584_v35, %v1946_v3  ;;  %v602_v4 = vmul.f32 %v584_v35, %v1948_v5  ;;  %v603_v39 = vmul.f32 %v584_v35, %v1950_v6  ;;  %v604_v40 = vmul.f32 %v584_v35, %v1952_v8  ;;  %v21_v35 = vld [vmem:[%s2232_s1 + $0x30] sm:$0xff] }
 0x2da   :  { %v637_v41 = vadd.f32 %v620_v30, %v601_v36  ;;  %v639_v43 = vadd.f32 %v620_v30, %v603_v39  ;;  %v638_v46 = vadd.f32 %v620_v30, %v602_v4  ;;  %v640_v47 = vadd.f32 %v620_v30, %v604_v40  ;;  %v22_v36 = vld [vmem:[%s2232_s1 + $0x38] sm:$0xff] }
 0x2db   :  { %v589_v45 = vpop.permute.xlu1 %588 }
 0x2dc   :  { %v605_v48 = vmul.f32 %v589_v45, %v1960_v13  ;;  %v606_v49 = vmul.f32 %v589_v45, %v1962_v14  ;;  %v607_v50 = vmul.f32 %v589_v45, %v1964_v16  ;;  %v608_v51 = vmul.f32 %v589_v45, %v1968_v19 }
 0x2dd   :  { %v653_v3 = vmax.f32 %v637_v41, 0.0  ;;  %v655_v52 = vmax.f32 %v639_v43, 0.0  ;;  %v654_v8 = vmax.f32 %v638_v46, 0.0  ;;  %v656_v56 = vmax.f32 %v640_v47, 0.0 }
 0x2de   :  { %v641_v5 = vadd.f32 %v625_v33, %v605_v48  ;;  %v642_v53 = vadd.f32 %v625_v33, %v606_v49  ;;  %v643_v6 = vadd.f32 %v625_v33, %v607_v50  ;;  %v644_v55 = vadd.f32 %v625_v33, %v608_v51 }
 0x2df   :  { %v594_v54 = vpop.permute.xlu1 %593 }
 0x2e0   :  { %v657_v57 = vmax.f32 %v641_v5, 0.0  ;;  %v609_v58 = vmul.f32 %v594_v54, %v1976_v25  ;;  %v610_v13 = vmul.f32 %v594_v54, %v1978_v26  ;;  %v611_v14 = vmul.f32 %v594_v54, %v1982_v31 }
 0x2e1   :  { %v659_v59 = vmax.f32 %v643_v6, 0.0  ;;  %v612_v16 = vmul.f32 %v594_v54, %v1984_v32  ;;  %v658_v19 = vmax.f32 %v642_v53, 0.0  ;;  %v660_v60 = vmax.f32 %v644_v55, 0.0 }
 0x2e2   :  { %v1548_v61 = vpack.c.bf16 %v657_v57, %v653_v3  ;;  %v645_v2 = vadd.f32 %v630_v34, %v609_v58  ;;  %v647_v7 = vadd.f32 %v630_v34, %v611_v14  ;;  %v646_v25 = vadd.f32 %v630_v34, %v610_v13 }
 0x2e3   :  { %v599_v62 = vpop.permute.xlu1 %598  ;;  %v1546_v63 = vpack.c.bf16 %v658_v19, %v654_v8  ;;  %v1554_v0 = vpack.c.bf16 %v660_v60, %v656_v56  ;;  %v1556_v1 = vpack.c.bf16 %v659_v59, %v655_v52  ;;  %v648_v26 = vadd.f32 %v630_v34, %v612_v16  ;;  %v20_v34 = vld [vmem:[%s2232_s1 + $0x28] sm:$0xff] }
 0x2e4   :  { %v613_v9 = vmul.f32 %v599_v62, %v1992_v37  ;;  %v614_v31 = vmul.f32 %v599_v62, %v1994_v38  ;;  %v615_v10 = vmul.f32 %v599_v62, %v1998_v42  ;;  %v616_v32 = vmul.f32 %v599_v62, %v2000_v44  ;;  %v19_v44 = vld [vmem:[%s2232_s1 + $0x20] sm:$0xff] }
 0x2e5   :  { %1547 = vmatprep.subr.bf16.mxu0 %v1546_v63  ;;  %1555 = vmatprep.subr.bf16.mxu1 %v1554_v0  ;;  %v661_v20 = vmax.f32 %v645_v2, 0.0  ;;  %v663_v21 = vmax.f32 %v647_v7, 0.0  ;;  %v662_v37 = vmax.f32 %v646_v25, 0.0  ;;  %v664_v22 = vmax.f32 %v648_v26, 0.0 }
 0x2e6   :  { %1549 = vmatpush1.bf16.msra.mxu0 %v1548_v61  ;;  %1557 = vmatpush1.bf16.msra.mxu1 %v1556_v1 }
 0x2e7   :  { %v635_v11 = vpop.permute.xlu1 %634 }
 0x2e8   :  { %v649_v12 = vadd.f32 %v635_v11, %v613_v9  ;;  %v650_v15 = vadd.f32 %v635_v11, %v614_v31  ;;  %v651_v17 = vadd.f32 %v635_v11, %v615_v10  ;;  %v652_v18 = vadd.f32 %v635_v11, %v616_v32 }
 0x2ea   :  { %v665_v23 = vmax.f32 %v649_v12, 0.0  ;;  %v667_v24 = vmax.f32 %v651_v17, 0.0  ;;  %v666_v27 = vmax.f32 %v650_v15, 0.0  ;;  %v668_v28 = vmax.f32 %v652_v18, 0.0 }
 0x2ec   :  { %v1550_v38 = vpack.c.bf16 %v666_v27, %v662_v37  ;;  %v1558_v30 = vpack.c.bf16 %v668_v28, %v664_v22  ;;  %v1552_v42 = vpack.c.bf16 %v665_v23, %v661_v20  ;;  %v1560_v33 = vpack.c.bf16 %v667_v24, %v663_v21 }
 0x2ee   :  { %1551 = vmatprep.subr.bf16.mxu0 %v1550_v38  ;;  %1559 = vmatprep.subr.bf16.mxu1 %v1558_v30 }
 0x2ef   :  { %1553 = vmatpush1.bf16.msra.mxu0 %v1552_v42  ;;  %1561 = vmatpush1.bf16.msra.mxu1 %v1560_v33 }
 0x2f2   :  { %1360 = vmatmul.mubr.msk.f32.vlgmr.msra.gmra.mrb[8].mxu0 %vm669_vm2, %v19_v44  ;;  %1364 = vmatmul.mubr.msk.f32.vlgmr.msra.gmra.mrb[8].mxu1 %vm669_vm2, %v19_v44 }
 0x2f3   :  { %752 = vmatprep.mubr.f32.mxu0 %v1627_v29  ;;  %841 = vmatprep.mubr.f32.mxu1 %v1627_v29 }
 0x2f6   :  { %1361 = vmatmul.mubr.msk.f32.gmra.mrb[10].mxu0 %vm669_vm2, %v20_v34  ;;  %1365 = vmatmul.mubr.msk.f32.gmra.mrb[10].mxu1 %vm669_vm2, %v20_v34 }
 0x2f7   :  { %758 = vmatprep.mubr.f32.mxu0 %v1627_v29  ;;  %847 = vmatprep.mubr.f32.mxu1 %v1627_v29 }
 0x2fa   :  { %1362 = vmatmul.mubr.msk.f32.gmra.mrb[12].mxu0 %vm669_vm2, %v21_v35  ;;  %1366 = vmatmul.mubr.msk.f32.gmra.mrb[12].mxu1 %vm669_vm2, %v21_v35 }
 0x2fb   :  { %764 = vmatprep.mubr.f32.mxu0 %v1627_v29  ;;  %853 = vmatprep.mubr.f32.mxu1 %v1627_v29 }
 0x2fe   :  { %1363 = vmatmul.mubr.msk.f32.gmra.mrb[14].mxu0 %vm669_vm2, %v22_v36  ;;  %1367 = vmatmul.mubr.msk.f32.gmra.mrb[14].mxu1 %vm669_vm2, %v22_v36 }
 0x2ff   :  { %1111 = vmatprep.mubr.f32.mxu0 %v1627_v29  ;;  %1182 = vmatprep.mubr.f32.mxu1 %v1627_v29 }
 0x3c5   :  { %v2080_v4 = vpop.f32.mrb[8].mxu0  ;;  %v2082_v39 = vpop.f32.mrb[8].mxu1 }
 0x3c6   :  { %v884_v40 = vmul.f32 %v2080_v4, %v2080_v4  ;;  %v2086_v41 = vpop.f32.mrb[9].mxu0  ;;  %v2088_v43 = vpop.f32.mrb[9].mxu1  ;;  %v886_v29 = vmul.f32 %v2082_v39, %v2082_v39 }
 0x3c7   :  { %v860_v45 = vadd.f32 %v2086_v41, %v2080_v4  ;;  %v885_v46 = vmul.f32 %v2086_v41, %v2086_v41  ;;  %v887_v53 = vmul.f32 %v2088_v43, %v2088_v43 }
 0x3c9   :  { %v2096_v47 = vpop.f32.mrb[10].mxu0  ;;  %v2098_v48 = vpop.f32.mrb[10].mxu1  ;;  %v861_v49 = vadd.f32 %v860_v45, %v2082_v39  ;;  %v900_v50 = vadd.f32 %v885_v46, %v884_v40 }
 0x3ca   :  { %v888_v51 = vmul.f32 %v2096_v47, %v2096_v47  ;;  %v2103_v3 = vpop.f32.mrb[11].mxu0  ;;  %v890_v52 = vmul.f32 %v2098_v48, %v2098_v48  ;;  %v2107_v5 = vpop.f32.mrb[11].mxu1 }
 0x3cb   :  { %v865_v6 = vadd.f32 %v2103_v3, %v2096_v47  ;;  %v889_v54 = vmul.f32 %v2103_v3, %v2103_v3  ;;  %v862_v8 = vadd.f32 %v861_v49, %v2088_v43  ;;  %v901_v55 = vadd.f32 %v900_v50, %v886_v29 }
 0x3cc   :  { %v891_v60 = vmul.f32 %v2107_v5, %v2107_v5 }
 0x3cd   :  { %863 = vadd.xlane.f32.xlu1 %v862_v8  ;;  %v2116_v56 = vpop.f32.mrb[12].mxu0  ;;  %v2118_v57 = vpop.f32.mrb[12].mxu1  ;;  %v902_v58 = vadd.f32 %v901_v55, %v887_v53  ;;  %v905_v13 = vadd.f32 %v889_v54, %v888_v51  ;;  %v866_v14 = vadd.f32 %v865_v6, %v2098_v48 }
 0x3ce   :  { %v892_v59 = vmul.f32 %v2116_v56, %v2116_v56  ;;  %v2123_v16 = vpop.f32.mrb[13].mxu0  ;;  %v2125_v19 = vpop.f32.mrb[13].mxu1  ;;  %v894_v1 = vmul.f32 %v2118_v57, %v2118_v57 }
 0x3cf   :  { %v870_v61 = vadd.f32 %v2123_v16, %v2116_v56  ;;  %v893_v62 = vmul.f32 %v2123_v16, %v2123_v16  ;;  %903 = vadd.xlane.f32.xlu0 %v902_v58  ;;  %v906_v63 = vadd.f32 %v905_v13, %v890_v52  ;;  %v867_v0 = vadd.f32 %v866_v14, %v2107_v5 }
 0x3d0   :  { %v895_v18 = vmul.f32 %v2125_v19, %v2125_v19 }
 0x3d1   :  { %v2136_v2 = vpop.f32.mrb[14].mxu0  ;;  %v2138_v7 = vpop.f32.mrb[14].mxu1  ;;  %v907_v9 = vadd.f32 %v906_v63, %v891_v60  ;;  %v871_v25 = vadd.f32 %v870_v61, %v2118_v57  ;;  %v910_v26 = vadd.f32 %v893_v62, %v892_v59 }
 0x3d2   :  { %v896_v31 = vmul.f32 %v2136_v2, %v2136_v2  ;;  %v2143_v10 = vpop.f32.mrb[15].mxu0  ;;  %v898_v32 = vmul.f32 %v2138_v7, %v2138_v7  ;;  %v2147_v11 = vpop.f32.mrb[15].mxu1 }
 0x3d3   :  { %v875_v12 = vadd.f32 %v2143_v10, %v2136_v2  ;;  %v897_v15 = vmul.f32 %v2143_v10, %v2143_v10  ;;  %908 = vadd.xlane.f32.xlu1 %v907_v9  ;;  %868 = vadd.xlane.f32.xlu0 %v867_v0  ;;  %v872_v17 = vadd.f32 %v871_v25, %v2125_v19  ;;  %v28_v0 = vld [vmem:[%s2233_s2 + $0x20] sm:$0xff] }
 0x3d4   :  { %v911_v20 = vadd.f32 %v910_v26, %v894_v1  ;;  %v899_v24 = vmul.f32 %v2147_v11, %v2147_v11 }
 0x3d5   :  { %v876_v21 = vadd.f32 %v875_v12, %v2138_v7  ;;  %v915_v37 = vadd.f32 %v897_v15, %v896_v31 }
 0x3d6   :  { %v912_v22 = vadd.f32 %v911_v20, %v895_v18  ;;  %v38_v18 = vld [vmem:[%s2233_s2 + $0x70] sm:$0xff]  ;;  %v37_v20 = vld [vmem:[%s2233_s2 + $0x68] sm:$0xff] }
 0x3d7   :  { %873 = vadd.xlane.f32.xlu0 %v872_v17  ;;  %v877_v23 = vadd.f32 %v876_v21, %v2147_v11  ;;  %v916_v27 = vadd.f32 %v915_v37, %v898_v32  ;;  %v29_v32 = vld [vmem:[%s2233_s2 + $0x28] sm:$0xff]  ;;  %v30_v37 = vld [vmem:[%s2233_s2 + $0x30] sm:$0xff] }
 0x3d9   :  { %878 = vadd.xlane.f32.xlu1 %v877_v23  ;;  %v917_v28 = vadd.f32 %v916_v27, %v899_v24  ;;  %v31_v27 = vld [vmem:[%s2233_s2 + $0x38] sm:$0xff] }
 0x3db   :  { %913 = vadd.xlane.f32.xlu0 %v912_v22 }
 0x3dd   :  { %918 = vadd.xlane.f32.xlu1 %v917_v28 }
 0x45a   :  { %v864_v38 = vpop.xlane.xlu1 %863 }
 0x45b   :  { %v880_v30 = vmul.f32 0.001953125, %v864_v38 }
 0x45c   :  { %v904_v42 = vpop.xlane.xlu0 %903 }
 0x45d   :  { %v924_v33 = vmul.f32 %v880_v30, %v880_v30  ;;  %v920_v44 = vmul.f32 0.001953125, %v904_v42 }
 0x45f   :  { %v928_v34 = vsub.f32 %v920_v44, %v924_v33  ;;  %v39_v33 = vld [vmem:[%s2233_s2 + $0x78] sm:$0xff]  ;;  %v40_v44 = vld [vmem:[%s2233_s2 + $0x80] sm:$0xff] }
 0x460   :  { %v909_v35 = vpop.xlane.xlu1 %908  ;;  %v869_v36 = vpop.xlane.xlu0 %868 }
 0x461   :  { %v932_v40 = vmax.f32 %v928_v34, 0.0  ;;  %v881_v45 = vmul.f32 0.001953125, %v869_v36  ;;  %v921_v29 = vmul.f32 0.001953125, %v909_v35 }
 0x463   :  { %v936_v46 = vadd.f32 1e-05, %v932_v40  ;;  %v925_v49 = vmul.f32 %v881_v45, %v881_v45 }
 0x464   :  { %v874_v50 = vpop.xlane.xlu0 %873 }
 0x465   :  { %1592 = vrsqrt.f32 %v936_v46  ;;  %v929_v51 = vsub.f32 %v921_v29, %v925_v49  ;;  %v882_v52 = vmul.f32 0.001953125, %v874_v50 }
 0x466   :  { %v879_v53 = vpop.xlane.xlu1 %878 }
 0x467   :  { %v933_v6 = vmax.f32 %v929_v51, 0.0  ;;  %v883_v54 = vmul.f32 0.001953125, %v879_v53  ;;  %v926_v58 = vmul.f32 %v882_v52, %v882_v52 }
 0x468   :  { %v914_v8 = vpop.xlane.xlu0 %913 }
 0x469   :  { %v937_v55 = vadd.f32 1e-05, %v933_v6  ;;  %v922_v13 = vmul.f32 0.001953125, %v914_v8  ;;  %v927_v59 = vmul.f32 %v883_v54, %v883_v54 }
 0x46a   :  { %v919_v14 = vpop.xlane.xlu1 %918 }
 0x46b   :  { %1594 = vrsqrt.f32 %v937_v55  ;;  %v930_v60 = vsub.f32 %v922_v13, %v926_v58  ;;  %v923_v61 = vmul.f32 0.001953125, %v919_v14 }
 0x46d   :  { %v934_v62 = vmax.f32 %v930_v60, 0.0  ;;  %v931_v63 = vsub.f32 %v923_v61, %v927_v59 }
 0x46f   :  { %v1593_v1 = vpop.eup %1592  ;;  %v938_v9 = vadd.f32 1e-05, %v934_v62  ;;  %v935_v25 = vmax.f32 %v931_v63, 0.0 }
 0x470   :  { %v944_v26 = vmul.f32 %v1593_v1, %v28_v0 }
 0x471   :  { %1596 = vrsqrt.f32 %v938_v9  ;;  %v939_v31 = vadd.f32 1e-05, %v935_v25 }
 0x472   :  { %958 = vperm.xlu0 %1582, %v944_v26   ;;  %v948_v17 = vmul.f32 %v944_v26, %v880_v30 }
 0x473   :  { %1598 = vrsqrt.f32 %v939_v31 }
 0x474   :  { %v952_v23 = vsub.f32 %v37_v20, %v948_v17 }
 0x475   :  { %v1595_v12 = vpop.eup %1594 }
 0x476   :  { %v945_v15 = vmul.f32 %v1595_v12, %v29_v32 }
 0x478   :  { %v949_v21 = vmul.f32 %v945_v15, %v881_v45  ;;  %963 = vperm.xlu1 %1583, %v945_v15  }
 0x47a   :  { %v953_v22 = vsub.f32 %v38_v18, %v949_v21 }
 0x47b   :  { %v1597_v24 = vpop.eup %1596 }
 0x47c   :  { %999 = vperm.xlu0 %1582, %v953_v22   ;;  %994 = vperm.xlu1 %1583, %v952_v23   ;;  %v946_v28 = vmul.f32 %v1597_v24, %v30_v37 }
 0x47d   :  { %v1599_v38 = vpop.eup %1598 }
 0x47e   :  { %v947_v30 = vmul.f32 %v1599_v38, %v31_v27  ;;  %v950_v42 = vmul.f32 %v946_v28, %v882_v52 }
 0x480   :  { %968 = vperm.xlu1 %1583, %v946_v28   ;;  %973 = vperm.xlu0 %1582, %v947_v30   ;;  %v951_v34 = vmul.f32 %v947_v30, %v883_v54  ;;  %v954_v35 = vsub.f32 %v39_v33, %v950_v42 }
 0x482   :  { %v955_v36 = vsub.f32 %v40_v44, %v951_v34 }
 0x484   :  { %1004 = vperm.xlu1 %1583, %v954_v35   ;;  %1009 = vperm.xlu0 %1582, %v955_v36  }
 0x4f1   :  { %v959_v40 = vpop.permute.xlu0 %958 }
 0x4f2   :  { %v976_v51 = vmul.f32 %v959_v40, %v2080_v4  ;;  %v977_v52 = vmul.f32 %v959_v40, %v2086_v41  ;;  %v978_v53 = vmul.f32 %v959_v40, %v2082_v39  ;;  %v979_v6 = vmul.f32 %v959_v40, %v2088_v43  ;;  %v23_v40 = vld [vmem:[%s2232_s1 + $0x40] sm:$0x1] }
 0x4f7   :  { %v964_v45 = vpop.permute.xlu1 %963 }
 0x4f8   :  { %v980_v46 = vmul.f32 %v964_v45, %v2096_v47  ;;  %v981_v29 = vmul.f32 %v964_v45, %v2103_v3  ;;  %v982_v49 = vmul.f32 %v964_v45, %v2098_v48  ;;  %v983_v50 = vmul.f32 %v964_v45, %v2107_v5 }
 0x4fb   :  { %v1000_v54 = vpop.permute.xlu0 %999  ;;  %v995_v8 = vpop.permute.xlu1 %994 }
 0x4fc   :  { %v1016_v55 = vadd.f32 %v1000_v54, %v980_v46  ;;  %v1017_v58 = vadd.f32 %v1000_v54, %v981_v29  ;;  %v1018_v13 = vadd.f32 %v1000_v54, %v982_v49  ;;  %v1019_v47 = vadd.f32 %v1000_v54, %v983_v50 }
 0x4fd   :  { %v1012_v14 = vadd.f32 %v995_v8, %v976_v51  ;;  %v1013_v3 = vadd.f32 %v995_v8, %v977_v52  ;;  %v1014_v59 = vadd.f32 %v995_v8, %v978_v53  ;;  %v1015_v48 = vadd.f32 %v995_v8, %v979_v6 }
 0x4fe   :  { %v1032_v60 = vmax.f32 %v1016_v55, 0.0  ;;  %v1034_v5 = vmax.f32 %v1018_v13, 0.0  ;;  %v1033_v61 = vmax.f32 %v1017_v58, 0.0  ;;  %v1035_v4 = vmax.f32 %v1019_v47, 0.0 }
 0x4ff   :  { %v1028_v62 = vmax.f32 %v1012_v14, 0.0  ;;  %v1030_v41 = vmax.f32 %v1014_v59, 0.0  ;;  %v974_v63 = vpop.permute.xlu0 %973  ;;  %v969_v39 = vpop.permute.xlu1 %968  ;;  %v1029_v0 = vmax.f32 %v1013_v3, 0.0  ;;  %v1031_v43 = vmax.f32 %v1015_v48, 0.0 }
 0x500   :  { %v988_v1 = vmul.f32 %v974_v63, %v2136_v2  ;;  %v989_v9 = vmul.f32 %v974_v63, %v2143_v10  ;;  %v990_v25 = vmul.f32 %v974_v63, %v2138_v7  ;;  %v991_v26 = vmul.f32 %v974_v63, %v2147_v11 }
 0x501   :  { %v1562_v31 = vpack.c.bf16 %v1033_v61, %v1029_v0  ;;  %v1570_v32 = vpack.c.bf16 %v1035_v4, %v1031_v43  ;;  %v1564_v12 = vpack.c.bf16 %v1032_v60, %v1028_v62  ;;  %v1572_v15 = vpack.c.bf16 %v1034_v5, %v1030_v41 }
 0x502   :  { %v984_v17 = vmul.f32 %v969_v39, %v2116_v56  ;;  %v985_v18 = vmul.f32 %v969_v39, %v2123_v16  ;;  %v986_v20 = vmul.f32 %v969_v39, %v2118_v57  ;;  %v987_v21 = vmul.f32 %v969_v39, %v2125_v19 }
 0x503   :  { %v1010_v37 = vpop.permute.xlu0 %1009  ;;  %v1005_v2 = vpop.permute.xlu1 %1004  ;;  %1563 = vmatprep.subr.bf16.mxu0 %v1562_v31  ;;  %1571 = vmatprep.subr.bf16.mxu1 %v1570_v32  ;;  %v41_v31 = vld [vmem:[%s2233_s2 + $0x88] sm:$0x1] }
 0x504   :  { %v1024_v10 = vadd.f32 %v1010_v37, %v988_v1  ;;  %v1025_v7 = vadd.f32 %v1010_v37, %v989_v9  ;;  %v1026_v22 = vadd.f32 %v1010_v37, %v990_v25  ;;  %v1027_v11 = vadd.f32 %v1010_v37, %v991_v26  ;;  %1565 = vmatpush1.bf16.msra.mxu0 %v1564_v12  ;;  %v32_v9 = vld [vmem:[%s2233_s2 + $0x40] sm:$0x1]  ;;  %s1629_s2 = smov [#allocation2]  }
 0x505   :  { %1573 = vmatpush1.bf16.msra.mxu1 %v1572_v15  ;;  %v1020_v23 = vadd.f32 %v1005_v2, %v984_v17  ;;  %v1021_v24 = vadd.f32 %v1005_v2, %v985_v18  ;;  %v1022_v28 = vadd.f32 %v1005_v2, %v986_v20  ;;  %v1023_v16 = vadd.f32 %v1005_v2, %v987_v21  ;;  %s1280_s29 = sshll.u32 %s1629_s2, 4  ;;  %s1281_s29 = int_to_ptr.vmem [resolvable:$true] %s1280_s29 }
 0x506   :  { %v1040_v27 = vmax.f32 %v1024_v10, 0.0  ;;  %v1042_v56 = vmax.f32 %v1026_v22, 0.0  ;;  %v1041_v30 = vmax.f32 %v1025_v7, 0.0  ;;  %v1043_v19 = vmax.f32 %v1027_v11, 0.0  ;;  %s1602_s30 = scalar_lea.vmem %s1281_s29, 64  ;;  %p1607_p1 = scmp.lt.s32.totalorder %s1281_s29, %s1281_s29 }
 0x507   :  { %v1036_v38 = vmax.f32 %v1020_v23, 0.0  ;;  %v1037_v57 = vmax.f32 %v1021_v24, 0.0  ;;  %v1038_v42 = vmax.f32 %v1022_v28, 0.0  ;;  %v1039_v33 = vmax.f32 %v1023_v16, 0.0  ;;  %p1603_p0 = scmp.ne.s32.totalorder %s1281_s29, %s1602_s30  ;;  %p1608_p2 = scmp.lt.s32.totalorder %s1602_s30, %s1602_s30 }
 0x508   :  { %v1628_v15 = vmov 1966171168   ;;  %v1249_v18 = vlaneseq }
 0x509   :  { %v1566_v44 = vpack.c.bf16 %v1041_v30, %v1037_v57  ;;  %v1568_v34 = vpack.c.bf16 %v1040_v27, %v1036_v38  ;;  %v1574_v35 = vpack.c.bf16 %v1043_v19, %v1039_v33  ;;  %v1576_v36 = vpack.c.bf16 %v1042_v56, %v1038_v42  ;;  %p1609_p3 = por %p1608_p2, %p1607_p1 }
 0x50a   :  { %v1247_v17 = vunpack.c.l.s4 %v1628_v15  ;;  %v1250_v37 = vshrl.u32 %v1249_v18, 7  ;;  %vm1271_vm4 = vcmp.lt.s32.totalorder %v1249_v18, 512 }
 0x50b   :  { %1567 = vmatprep.subr.bf16.mxu0 %v1566_v44  ;;  %1575 = vmatprep.subr.bf16.mxu1 %v1574_v35  ;;  %p1610_p4 = pnand %p1609_p3, %p1603_p0 }
 0x50c   :  { %1569 = vmatpush1.bf16.msra.mxu0 %v1568_v34  ;;  %1577 = vmatpush1.bf16.msra.mxu1 %v1576_v36  ;;  %v1248_v21 = vunpack.c.0.s8 %v1247_v17 }
 0x50e   :  { %v1251_v23 = vsub.s32 %v1248_v21, %v1250_v37 }
 0x50f   :  { %1368 = vmatmul.mubr.msk.f32.vlgmr.msra.gmra.mrb[16].mxu0 %vm669_vm2, %v23_v40  ;;  %1369 = vmatmul.mubr.msk.f32.vlgmr.msra.gmra.mrb[16].mxu1 %vm669_vm2, %v23_v40 }
 0x5e2   :  { %v1113_v45 = vpop.f32.mrb[16].mxu0  ;;  %v1184_v50 = vpop.f32.mrb[16].mxu1 }
 0x5e3   :  { %v1190_v46 = vsel %vm1189_vm3, %v1113_v45, 0.0  ;;  %v1200_v29 = vmul.f32 %v1113_v45, %v1113_v45  ;;  %v1115_v49 = vpop.f32.mrb[17].mxu0  ;;  %v1193_v53 = vsel %vm1189_vm3, %v1184_v50, 0.0  ;;  %v1202_v6 = vmul.f32 %v1184_v50, %v1184_v50  ;;  %v1186_v54 = vpop.f32.mrb[17].mxu1 }
 0x5e4   :  { %v1191_v51 = vsel %vm1189_vm3, %v1115_v49, 0.0  ;;  %v1201_v52 = vmul.f32 %v1115_v49, %v1115_v49  ;;  %v1203_v13 = vmul.f32 %v1186_v54, %v1186_v54  ;;  %v1195_v59 = vsel %vm1189_vm3, %v1186_v54, 0.0 }
 0x5e5   :  { %v1204_v8 = vsel %vm1189_vm3, %v1200_v29, 0.0  ;;  %v1192_v55 = vadd.f32 %v1191_v51, %v1190_v46  ;;  %v1207_v47 = vsel %vm1189_vm3, %v1202_v6, 0.0 }
 0x5e6   :  { %v1205_v58 = vsel %vm1189_vm3, %v1201_v52, 0.0  ;;  %v1209_v5 = vsel %vm1189_vm3, %v1203_v13, 0.0 }
 0x5e7   :  { %v1206_v14 = vadd.f32 %v1205_v58, %v1204_v8  ;;  %v1194_v3 = vadd.f32 %v1193_v53, %v1192_v55 }
 0x5e9   :  { %v1196_v48 = vadd.f32 %v1195_v59, %v1194_v3  ;;  %v1208_v60 = vadd.f32 %v1207_v47, %v1206_v14 }
 0x5eb   :  { %1197 = vadd.xlane.f32.xlu1 %v1196_v48  ;;  %v1210_v61 = vadd.f32 %v1209_v5, %v1208_v60 }
 0x5ed   :  { %1211 = vadd.xlane.f32.xlu0 %v1210_v61 }
 0x678   :  { %v1198_v4 = vpop.xlane.xlu1 %1197 }
 0x679   :  { %v1199_v62 = vmul.f32 0.001953125, %v1198_v4 }
 0x67a   :  { %v1212_v41 = vpop.xlane.xlu0 %1211 }
 0x67b   :  { %v1214_v63 = vmul.f32 %v1199_v62, %v1199_v62  ;;  %v1213_v39 = vmul.f32 0.001953125, %v1212_v41 }
 0x67d   :  { %v1215_v0 = vsub.f32 %v1213_v39, %v1214_v63 }
 0x67f   :  { %v1216_v43 = vmax.f32 %v1215_v0, 0.0 }
 0x681   :  { %v1217_v1 = vadd.f32 1e-05, %v1216_v43 }
 0x683   :  { %1600 = vrsqrt.f32 %v1217_v1 }
 0x68d   :  { %v1601_v25 = vpop.eup %1600 }
 0x68e   :  { %v1219_v26 = vmul.f32 %v1601_v25, %v32_v9 }
 0x690   :  { %1224 = vperm.xlu0 %1582, %v1219_v26   ;;  %v1220_v32 = vmul.f32 %v1219_v26, %v1199_v62 }
 0x692   :  { %v1221_v12 = vsub.f32 %v41_v31, %v1220_v32 }
 0x694   :  { %1233 = vperm.xlu1 %1583, %v1221_v12  }
 0x70f   :  { %v1225_v20 = vpop.permute.xlu0 %1224 }
 0x710   :  { %v1227_v2 = vmul.f32 %v1225_v20, %v1113_v45  ;;  %v1228_v10 = vmul.f32 %v1225_v20, %v1115_v49  ;;  %v1229_v7 = vmul.f32 %v1225_v20, %v1184_v50  ;;  %v1230_v22 = vmul.f32 %v1225_v20, %v1186_v54 }
 0x713   :  { %v1234_v11 = vpop.permute.xlu1 %1233 }
 0x714   :  { %v1236_v24 = vadd.f32 %v1234_v11, %v1227_v2  ;;  %v1237_v27 = vadd.f32 %v1234_v11, %v1228_v10  ;;  %v1238_v56 = vadd.f32 %v1234_v11, %v1229_v7  ;;  %v1239_v28 = vadd.f32 %v1234_v11, %v1230_v22 }
 0x716   :  { %v1244_v16 = vcombine.low %v1236_v24, %v1237_v27  ;;  %v1245_v38 = vcombine.low %v1238_v56, %v1239_v28 }
 0x718   :  { %v1252_v57 = vrot.slane %v1244_v16, %v1251_v23  ;;  %v1259_v30 = vrot.slane %v1245_v38, %v1251_v23 }
 0x71a   :  { %v1260_v19 = vcombine.low %v1252_v57, %v1259_v30 }
 0x71c   :  { %v1267_v42 = vrot.slane %v1260_v19, %v1251_v23 }
 0x71e   :  { %1273 = vst.msk [vmem:[#allocation2] sm:$0xf] %vm1271_vm4, %v1267_v42 }
 0x71f   :  { %1613 = shalt.err (!%p1610_p4)
}
 0x720   :  { %s1614_s6 = scalar_lea.hbm %s2234_s3, 64 }
 0x721   :  { %p1615_p5 = scmp.ne.s32.totalorder %s2234_s3, %s1614_s6  ;;  %p1618_p6 = scmp.lt.u32.totalorder %s1614_s6, %s2234_s3 }
 0x723   :  { %p1620_p7 = pnand %p1618_p6, %p1615_p5 }
 0x725   :  { %1623 = shalt.err (!%p1620_p7)
}
 0x726   :  { %1283 = dma.vmem_to_hbm [thread:$0]  %s1281_s29, 64, %s2234_s3, [#allocation3]  }
 0x727   :  { %1624 = dma.done.wait [#allocation3], 64  }
 0x728   :  { %1625 = vsyncadd [#allocation3], 4294967232 }
 0x729   :  { %1287 = vsyncpa [#allocation3], 1 }

</bundles_post_ra>
